<compile_context>
chip_gen: v7x
topology: tpu7x:2x2x1
jax: 0.10.0
libtpu: 0.0.40
codegen_flags: <defaults>
</compile_context>

<pallas_src>
import math
from functools import partial

import numpy as np
import jax
import jax.numpy as jnp
from jax.experimental import pallas as pl
from jax.experimental.pallas import tpu as pltpu


# ----------------------------------------------------------------------------
# taps
# ----------------------------------------------------------------------------
def make_blur_kernel_1d(kernel_size: int):
    """Normalized binomial (Pascal) 1-D taps, as static python floats."""
    assert 2 <= kernel_size <= 7
    k1d = [math.comb(kernel_size - 1, i) for i in range(kernel_size)]
    s = float(sum(k1d))
    return [float(v) / s for v in k1d]


def make_blur_kernel_2d(kernel_size: int):
    """Same as Blur.make_kernel: separable outer product of the 1-D taps."""
    k1d = jnp.asarray(make_blur_kernel_1d(kernel_size), dtype=jnp.float32)
    return k1d[None, :] * k1d[:, None]


def _round_up(x: int, m: int) -> int:
    return (x + m - 1) // m * m


def _fir_decimation_matrix(taps, in_len, out_len, down):
    """Banded matrix M with M[j*down + a, j] = taps[a]  (FIR + decimation)."""
    m = np.zeros((in_len, out_len), np.float32)
    for j in range(out_len):
        for a, tap in enumerate(taps):
            m[j * down + a, j] = tap
    return m


def _choose_channels_per_block(c, n, per_channel_bytes, budget=24 << 20):
    """Largest channel tile that fits the VMEM budget, keeping >=2 grid blocks."""
    divisors = [d for d in range(1, c + 1) if c % d == 0]
    ct = 1
    for d in divisors:
        if d * per_channel_bytes <= budget:
            ct = d
    if n * (c // ct) < 2:                      # give v7x's 2 TensorCores work
        smaller = [d for d in divisors if n * (c // d) >= 2]
        if smaller:
            ct = max(smaller)
    return ct


# ----------------------------------------------------------------------------
# kernel bodies
# ----------------------------------------------------------------------------
def _fill_padded_plane(x_ref, xpad_ref, *, py1, py2, px1, px2, hu, wu, hp, wp):
    """Zero only the pad borders, then copy the plane interior (input dtype)."""
    ct = xpad_ref.shape[0]
    dt = xpad_ref.dtype
    if py1:
        xpad_ref[:, pl.ds(0, py1), :] = jnp.zeros((ct, py1, wp), dt)
    if py2:
        xpad_ref[:, pl.ds(py1 + hu, py2), :] = jnp.zeros((ct, py2, wp), dt)
    if px1:
        xpad_ref[:, :, pl.ds(0, px1)] = jnp.zeros((ct, hp, px1), dt)
    if px2:
        xpad_ref[:, :, pl.ds(px1 + wu, px2)] = jnp.zeros((ct, hp, px2), dt)
    xpad_ref[:, pl.ds(py1, hu), pl.ds(px1, wu)] = x_ref[...]


def _blur_kernel_sep(x_ref, o_ref, xpad_ref, tv_ref, *, taps, k,
                     py1, py2, px1, px2, hu, wu, hp, wp,
                     h_out, w_out, t, n_strips):
    """down == 1 path: separable VPU FIR, strip-mined over output rows."""
    _fill_padded_plane(x_ref, xpad_ref, py1=py1, py2=py2, px1=px1, px2=px2,
                       hu=hu, wu=wu, hp=hp, wp=wp)

    def strip(s, carry):
        r0 = jnp.minimum(s * t, h_out - t)       # clamped ragged last strip
        # vertical 1-D FIR: sublane-offset window reads, f32 accumulation
        tv = taps[0] * xpad_ref[:, pl.ds(r0, t), :].astype(jnp.float32)
        for a in range(1, k):
            tv = tv + taps[a] * xpad_ref[:, pl.ds(r0 + a, t), :].astype(jnp.float32)
        tv_ref[...] = tv.astype(tv_ref.dtype)
        # horizontal 1-D FIR: k lane-offset window reads from the VMEM scratch
        acc = taps[0] * tv_ref[:, :, pl.ds(0, w_out)].astype(jnp.float32)
        for b in range(1, k):
            acc = acc + taps[b] * tv_ref[:, :, pl.ds(b, w_out)].astype(jnp.float32)
        o_ref[:, pl.ds(r0, t), :] = acc.astype(o_ref.dtype)
        return carry

    jax.lax.fori_loop(0, n_strips, strip, 0)


def _blur_kernel_dec(x_ref, sh_ref, sv_ref, o_ref, xpad_ref, *,
                     py1, py2, px1, px2, hu, wu, hp, wp,
                     h_out, w_out, t, span, n_strips, down):
    """down > 1 path: FIR + H/W decimation fused as two banded MXU matmuls."""
    _fill_padded_plane(x_ref, xpad_ref, py1=py1, py2=py2, px1=px1, px2=px2,
                       hu=hu, wu=wu, hp=hp, wp=wp)

    def strip(s, carry):
        r0 = jnp.minimum(s * t, h_out - t)
        pr0 = r0 * down
        xs = xpad_ref[:, pl.ds(pr0, span), :].astype(jnp.float32)
        xs = xs.reshape(span, wp)
        th = jnp.dot(xs, sh_ref[...], preferred_element_type=jnp.float32)   # (span, w_out)
        ot = jnp.dot(sv_ref[...], th, preferred_element_type=jnp.float32)   # (t,    w_out)
        o_ref[:, pl.ds(r0, t), :] = ot.reshape(1, t, w_out).astype(o_ref.dtype)
        return carry

    jax.lax.fori_loop(0, n_strips, strip, 0)


# ----------------------------------------------------------------------------
# wrapper
# ----------------------------------------------------------------------------
def upfirdn2d_pallas(imgs, kernel_size, up, down, px1, px2, py1, py2):
    """Forward-pass equivalent of the PyTorch upfirdn2d (cross-correlation,
    matching F.conv2d semantics; the binomial kernel is symmetric anyway)."""
    n, c, h, w = imgs.shape
    k = int(kernel_size)
    taps = make_blur_kernel_1d(k)
    dtype = imgs.dtype
    itemsize = jnp.dtype(dtype).itemsize

    if up > 1:
        # TODO(synk): fuse zero-upsampling in-kernel (polyphase); for now XLA
        # materialises the zero-inserted tensor once in NCHW (no transposes).
        z = jnp.zeros((n, c, h * up, w * up), dtype)
        imgs = z.at[:, :, ::up, ::up].set(imgs)
    hu, wu = h * up, w * up
    hp, wp = hu + py1 + py2, wu + px1 + px2
    h_out = (hp - k) // down + 1
    w_out = (wp - k) // down + 1

    wp_l, wu_l, wo_l = _round_up(wp, 128), _round_up(wu, 128), _round_up(w_out, 128)

    if down == 1:
        per_ch = (2 * (hu * wu_l + h_out * wo_l) + hp * wp_l + 32 * wp_l) * itemsize
        ct = _choose_channels_per_block(c, n, per_ch)
        t = min(64, max(8, (32 * 1024) // max(1, w_out * ct)))
        t = (t // 8) * 8
        t = max(1, min(t, h_out))
        n_strips = pl.cdiv(h_out, t)

        need = ct * (2 * (_round_up(hu, 8) * wu_l + _round_up(h_out, 8) * wo_l)
                     + _round_up(hp, 8) * wp_l + _round_up(t, 8) * wp_l) * itemsize
        vmem_limit = int(min(112 << 20, max(32 << 20, 2 * need)))

        kern = partial(_blur_kernel_sep, taps=taps, k=k, py1=py1, py2=py2,
                       px1=px1, px2=px2, hu=hu, wu=wu, hp=hp, wp=wp,
                       h_out=h_out, w_out=w_out, t=t, n_strips=n_strips)
        return pl.pallas_call(
            kern,
            out_shape=jax.ShapeDtypeStruct((n, c, h_out, w_out), dtype),
            grid=(n, c // ct),
            in_specs=[pl.BlockSpec((None, ct, hu, wu), lambda i, j: (i, j, 0, 0))],
            out_specs=pl.BlockSpec((None, ct, h_out, w_out),
                                   lambda i, j: (i, j, 0, 0)),
            scratch_shapes=[pltpu.VMEM((ct, hp, wp), dtype),     # padded plane
                            pltpu.VMEM((ct, t, wp), dtype)],     # vertical strip
            compiler_params=pltpu.CompilerParams(
                dimension_semantics=("parallel", "parallel"),
                vmem_limit_bytes=vmem_limit),
        )(imgs)

    # ---- down > 1: fused H/W decimation, one channel per block --------------
    ct = 1
    t = max(1, min(16, h_out))
    span = (t - 1) * down + k
    n_strips = pl.cdiv(h_out, t)
    sh = jnp.asarray(_fir_decimation_matrix(taps, wp, w_out, down))        # (wp, w_out)
    sv = jnp.asarray(_fir_decimation_matrix(taps, span, t, down).T)        # (t,  span)

    need = ((2 * (_round_up(hu, 8) * wu_l + _round_up(h_out, 8) * wo_l)
             + _round_up(hp, 8) * wp_l) * itemsize
            + 2 * 4 * (_round_up(wp, 8) * wo_l
                       + _round_up(t, 8) * _round_up(span, 128)))
    vmem_limit = int(min(112 << 20, max(32 << 20, 2 * need)))

    kern = partial(_blur_kernel_dec, py1=py1, py2=py2, px1=px1, px2=px2,
                   hu=hu, wu=wu, hp=hp, wp=wp, h_out=h_out, w_out=w_out,
                   t=t, span=span, n_strips=n_strips, down=down)
    return pl.pallas_call(
        kern,
        out_shape=jax.ShapeDtypeStruct((n, c, h_out, w_out), dtype),
        grid=(n, c),
        in_specs=[pl.BlockSpec((None, 1, hu, wu), lambda i, j: (i, j, 0, 0)),
                  pl.BlockSpec((wp, w_out), lambda i, j: (0, 0)),
                  pl.BlockSpec((t, span), lambda i, j: (0, 0))],
        out_specs=pl.BlockSpec((None, 1, h_out, w_out), lambda i, j: (i, j, 0, 0)),
        scratch_shapes=[pltpu.VMEM((1, hp, wp), dtype)],
        compiler_params=pltpu.CompilerParams(
            dimension_semantics=("parallel", "parallel"),
            vmem_limit_bytes=vmem_limit),
    )(imgs, sh, sv)


class BlurPallas:
    """Pallas-TPU equivalent of the PyTorch Blur module's forward pass."""

    def __init__(self, kernel_size: int = 3, up: int = 1, down: int = 1):
        self.kernel_size = kernel_size
        self.up = up
        self.down = down
        self.p1 = (kernel_size - 1) // 2
        self.p2 = kernel_size - 1 - self.p1
        self.kernel = make_blur_kernel_2d(kernel_size)   # for parity/inspection

    def __call__(self, imgs):
        return upfirdn2d_pallas(imgs, self.kernel_size, self.up, self.down,
                                self.p1, self.p2, self.p1, self.p2)


# ----------------------------------------------------------------------------
# reference + test
# ----------------------------------------------------------------------------
def _reference_upfirdn2d(imgs, kernel2d, up, down, px1, px2, py1, py2):
    """Pure-JAX reference mirroring the PyTorch code (sanity check)."""
    n, c, h, w = imgs.shape
    k = kernel2d.shape[0]
    if up > 1:
        z = jnp.zeros((n, c, h * up, w * up), imgs.dtype)
        imgs = z.at[:, :, ::up, ::up].set(imgs)
    x = jnp.pad(imgs, ((0, 0), (0, 0), (py1, py2), (px1, px2)))
    rhs = jnp.broadcast_to(kernel2d[None, None], (c, 1, k, k))
    return jax.lax.conv_general_dilated(
        x, rhs, window_strides=(down, down), padding="VALID",
        feature_group_count=c,
        dimension_numbers=("NCHW", "OIHW", "NCHW"))


if __name__ == "__main__":
    key = jax.random.PRNGKey(0)
    x = jax.random.normal(key, (2, 4, 16, 16), dtype=jnp.float32)

    # (kernel_size, up, down): default blur, even-k asymmetric padding,
    # upsample path, and the fused-decimation (MXU) path.
    configs = [(3, 1, 1), (4, 1, 1), (3, 2, 1), (3, 1, 2), (4, 2, 2)]
    for ks, up, down in configs:
        blur = BlurPallas(kernel_size=ks, up=up, down=down)
        y = jax.block_until_ready(blur(x))
        y_ref = _reference_upfirdn2d(x, blur.kernel, up, down,
                                     blur.p1, blur.p2, blur.p1, blur.p2)
        assert y.shape == y_ref.shape, (ks, up, down, y.shape, y_ref.shape)
        # down>1 runs its FIR on the MXU; allow for bf16 matmul passes there.
        tol = 1e-5 if down == 1 else 3e-2
        assert jnp.allclose(y, y_ref, atol=tol, rtol=tol), (ks, up, down)
    print("KERNEL_OK")
</pallas_src>

<mosaic_0001>
module attributes {stable_mosaic.version = 11 : i64} {
  func.func @_blur_kernel_sep(%arg0: i32, %arg1: i32, %arg2: memref<1x4x16x16xf32, #tpu.memory_space<vmem>>, %arg3: memref<1x4x16x16xf32, #tpu.memory_space<vmem>>, %arg4: memref<4x18x18xf32, #tpu.memory_space<vmem>>, %arg5: memref<4x16x18xf32, #tpu.memory_space<vmem>>) attributes {dimension_semantics = [#tpu.dimension_semantics<parallel>, #tpu.dimension_semantics<parallel>], iteration_bounds = array<i64: 2, 1>, scalar_prefetch = 0 : i64, scratch_operands = 2 : i64, tpu.core_type = #tpu.core_type<tc>, window_params = [{transform_indices = @transform_0, window_bounds = array<i64: 1, 4, 16, 16>}, {transform_indices = @transform_1, window_bounds = array<i64: 1, 4, 16, 16>}]} {
    %cst = arith.constant 0.000000e+00 : f32
    %0 = vector.broadcast %cst : f32 to vector<4x1x18xf32>
    %c0 = arith.constant 0 : index
    %c0_0 = arith.constant 0 : index
    %c0_1 = arith.constant 0 : index
    %1 = vector.load %arg4[%c0, %c0_0, %c0_1] : memref<4x18x18xf32, #tpu.memory_space<vmem>>, vector<4x1x18xf32>
    tpu.vector_store %arg4[%c0, %c0_0, %c0_1], %0 {strides = array<i32>} : memref<4x18x18xf32, #tpu.memory_space<vmem>>, vector<4x1x18xf32>,
    %cst_2 = arith.constant 0.000000e+00 : f32
    %2 = vector.broadcast %cst_2 : f32 to vector<4x1x18xf32>
    %c0_3 = arith.constant 0 : index
    %c17 = arith.constant 17 : index
    %c0_4 = arith.constant 0 : index
    %3 = vector.load %arg4[%c0_3, %c17, %c0_4] : memref<4x18x18xf32, #tpu.memory_space<vmem>>, vector<4x1x18xf32>
    tpu.vector_store %arg4[%c0_3, %c17, %c0_4], %2 {strides = array<i32>} : memref<4x18x18xf32, #tpu.memory_space<vmem>>, vector<4x1x18xf32>,
    %cst_5 = arith.constant 0.000000e+00 : f32
    %4 = vector.broadcast %cst_5 : f32 to vector<4x18x1xf32>
    %c0_6 = arith.constant 0 : index
    %c0_7 = arith.constant 0 : index
    %c0_8 = arith.constant 0 : index
    %5 = vector.load %arg4[%c0_6, %c0_7, %c0_8] : memref<4x18x18xf32, #tpu.memory_space<vmem>>, vector<4x18x1xf32>
    tpu.vector_store %arg4[%c0_6, %c0_7, %c0_8], %4 {strides = array<i32>} : memref<4x18x18xf32, #tpu.memory_space<vmem>>, vector<4x18x1xf32>,
    %cst_9 = arith.constant 0.000000e+00 : f32
    %6 = vector.broadcast %cst_9 : f32 to vector<4x18x1xf32>
    %c0_10 = arith.constant 0 : index
    %c0_11 = arith.constant 0 : index
    %c17_12 = arith.constant 17 : index
    %7 = vector.load %arg4[%c0_10, %c0_11, %c17_12] : memref<4x18x18xf32, #tpu.memory_space<vmem>>, vector<4x18x1xf32>
    tpu.vector_store %arg4[%c0_10, %c0_11, %c17_12], %6 {strides = array<i32>} : memref<4x18x18xf32, #tpu.memory_space<vmem>>, vector<4x18x1xf32>,
    %c0_13 = arith.constant 0 : index
    %c0_14 = arith.constant 0 : index
    %c0_15 = arith.constant 0 : index
    %c0_16 = arith.constant 0 : index
    %8 = vector.load %arg2[%c0_13, %c0_14, %c0_15, %c0_16] : memref<1x4x16x16xf32, #tpu.memory_space<vmem>>, vector<1x4x16x16xf32>
    %9 = vector.shape_cast %8 : vector<1x4x16x16xf32> to vector<4x16x16xf32>
    %c0_17 = arith.constant 0 : index
    %c1 = arith.constant 1 : index
    %c1_18 = arith.constant 1 : index
    %10 = vector.load %arg4[%c0_17, %c1, %c1_18] : memref<4x18x18xf32, #tpu.memory_space<vmem>>, vector<4x16x16xf32>
    tpu.vector_store %arg4[%c0_17, %c1, %c1_18], %9 {strides = array<i32>} : memref<4x18x18xf32, #tpu.memory_space<vmem>>, vector<4x16x16xf32>,
    %c0_i32 = arith.constant 0 : i32
    %c16_i32 = arith.constant 16 : i32
    %11 = arith.muli %c0_i32, %c16_i32 : i32
    %c0_i32_19 = arith.constant 0 : i32
    %12 = arith.minsi %11, %c0_i32_19 : i32
    %c0_20 = arith.constant 0 : index
    %13 = arith.index_cast %12 : i32 to index
    %c0_21 = arith.constant 0 : index
    %14 = vector.load %arg4[%c0_20, %13, %c0_21] : memref<4x18x18xf32, #tpu.memory_space<vmem>>, vector<4x16x18xf32>
    %cst_22 = arith.constant 2.500000e-01 : f32
    %15 = vector.broadcast %cst_22 : f32 to vector<4x16x18xf32>
    %16 = arith.mulf %15, %14 : vector<4x16x18xf32>
    %c1_i32 = arith.constant 1 : i32
    %17 = arith.addi %12, %c1_i32 : i32
    %c0_23 = arith.constant 0 : index
    %18 = arith.index_cast %17 : i32 to index
    %c0_24 = arith.constant 0 : index
    %19 = vector.load %arg4[%c0_23, %18, %c0_24] : memref<4x18x18xf32, #tpu.memory_space<vmem>>, vector<4x16x18xf32>
    %cst_25 = arith.constant 5.000000e-01 : f32
    %20 = vector.broadcast %cst_25 : f32 to vector<4x16x18xf32>
    %21 = arith.mulf %20, %19 : vector<4x16x18xf32>
    %22 = arith.addf %16, %21 : vector<4x16x18xf32>
    %c2_i32 = arith.constant 2 : i32
    %23 = arith.addi %12, %c2_i32 : i32
    %c0_26 = arith.constant 0 : index
    %24 = arith.index_cast %23 : i32 to index
    %c0_27 = arith.constant 0 : index
    %25 = vector.load %arg4[%c0_26, %24, %c0_27] : memref<4x18x18xf32, #tpu.memory_space<vmem>>, vector<4x16x18xf32>
    %cst_28 = arith.constant 2.500000e-01 : f32
    %26 = vector.broadcast %cst_28 : f32 to vector<4x16x18xf32>
    %27 = arith.mulf %26, %25 : vector<4x16x18xf32>
    %28 = arith.addf %22, %27 : vector<4x16x18xf32>
    %c0_29 = arith.constant 0 : index
    %c0_30 = arith.constant 0 : index
    %c0_31 = arith.constant 0 : index
    %29 = vector.load %arg5[%c0_29, %c0_30, %c0_31] : memref<4x16x18xf32, #tpu.memory_space<vmem>>, vector<4x16x18xf32>
    tpu.vector_store %arg5[%c0_29, %c0_30, %c0_31], %28 {strides = array<i32>} : memref<4x16x18xf32, #tpu.memory_space<vmem>>, vector<4x16x18xf32>,
    %c0_32 = arith.constant 0 : index
    %c0_33 = arith.constant 0 : index
    %c0_34 = arith.constant 0 : index
    %30 = vector.load %arg5[%c0_32, %c0_33, %c0_34] : memref<4x16x18xf32, #tpu.memory_space<vmem>>, vector<4x16x16xf32>
    %cst_35 = arith.constant 2.500000e-01 : f32
    %31 = vector.broadcast %cst_35 : f32 to vector<4x16x16xf32>
    %32 = arith.mulf %31, %30 : vector<4x16x16xf32>
    %c0_36 = arith.constant 0 : index
    %c0_37 = arith.constant 0 : index
    %c1_38 = arith.constant 1 : index
    %33 = vector.load %arg5[%c0_36, %c0_37, %c1_38] : memref<4x16x18xf32, #tpu.memory_space<vmem>>, vector<4x16x16xf32>
    %cst_39 = arith.constant 5.000000e-01 : f32
    %34 = vector.broadcast %cst_39 : f32 to vector<4x16x16xf32>
    %35 = arith.mulf %34, %33 : vector<4x16x16xf32>
    %36 = arith.addf %32, %35 : vector<4x16x16xf32>
    %c0_40 = arith.constant 0 : index
    %c0_41 = arith.constant 0 : index
    %c2 = arith.constant 2 : index
    %37 = vector.load %arg5[%c0_40, %c0_41, %c2] : memref<4x16x18xf32, #tpu.memory_space<vmem>>, vector<4x16x16xf32>
    %cst_42 = arith.constant 2.500000e-01 : f32
    %38 = vector.broadcast %cst_42 : f32 to vector<4x16x16xf32>
    %39 = arith.mulf %38, %37 : vector<4x16x16xf32>
    %40 = arith.addf %36, %39 : vector<4x16x16xf32>
    %c0_43 = arith.constant 0 : index
    %c0_44 = arith.constant 0 : index
    %41 = arith.index_cast %12 : i32 to index
    %c0_45 = arith.constant 0 : index
    %42 = vector.load %arg3[%c0_43, %c0_44, %41, %c0_45] : memref<1x4x16x16xf32, #tpu.memory_space<vmem>>, vector<1x4x16x16xf32>
    %43 = vector.shape_cast %42 : vector<1x4x16x16xf32> to vector<4x16x16xf32>
    %44 = vector.shape_cast %40 : vector<4x16x16xf32> to vector<1x4x16x16xf32>
    tpu.vector_store %arg3[%c0_43, %c0_44, %41, %c0_45], %44 {strides = array<i32>} : memref<1x4x16x16xf32, #tpu.memory_space<vmem>>, vector<1x4x16x16xf32>,
    %c1_i32_46 = arith.constant 1 : i32
    return
  }
  func.func @transform_0(%arg0: i32, %arg1: i32) -> (i32, i32, i32, i32) {
    %c0_i32 = arith.constant 0 : i32
    %c0_i32_0 = arith.constant 0 : i32
    %c0_i32_1 = arith.constant 0 : i32
    return %arg0, %arg1, %c0_i32, %c0_i32_0 : i32, i32, i32, i32
  }
  func.func @transform_1(%arg0: i32, %arg1: i32) -> (i32, i32, i32, i32) {
    %c0_i32 = arith.constant 0 : i32
    %c0_i32_0 = arith.constant 0 : i32
    %c0_i32_1 = arith.constant 0 : i32
    return %arg0, %arg1, %c0_i32, %c0_i32_0 : i32, i32, i32, i32
  }
}

</mosaic_0001>

<bundles_post_ra>
// kernel: tpu_custom_call.1
= control target key start
LH: loop header
LB: loop body
LE: loop exit
PB: predicated region body
PF: predicated region fallthrough
CT: control target
= control target key end

     0   :  { %6 = vsyncpa [#allocation5], 0  ;;  %s986_s0 = inlined_call_operand.hbm [shape: f32[2,4,16,16], index: 0, kind: input, shape index: {}]   ;;  %s987_s1 = inlined_call_operand.hbm [shape: f32[2,4,16,16], index: 1, kind: output, shape index: {}]  }
   0x1   :  { %8 = vsyncpa [#allocation5 + $0x1], 0 }
   0x2   :  { %9 = vsyncpa [#allocation6], 0 }
   0x3   :  { %11 = vsyncpa [#allocation6 + $0x1], 0  ;;  %s753_s6 = smov 0   ;;  %s755_s7 = smov 0  }
   0x4   :  { %s757_s8 = smov 0   ;;  %s759_s9 = smov 0  }
   0x5   :  { %s761_s10 = smov 0   ;;  %s763_s11 = smov 0  }
   0x6 LB: > { %s532_s12 = sadd.s32 4294967295, %s731_s11   ;;  %s533_s13 = sadd.s32 4294967294, %s731_s11   ;;  %s731_s11 = sphi %s763_s11, %s17_s11   ;;  %s727_s10 = sphi %s761_s10, %s1002_s10   ;;  %s723_s9 = sphi %s759_s9, %s1001_s9   ;;  %s719_s8 = sphi %s757_s8, %s1000_s8   ;;  %s715_s7 = sphi %s755_s7, %s999_s7   ;;  %s711_s6 = sphi %s753_s6, %s998_s6  }
   0x7   : > { %s29_s14 = sadd.s32 1, %s727_s10  ;;  %s38_s15 = sadd.s32 1, %s719_s8 }
   0x8   : > { %p31_p0 = scmp.ge.s32.totalorder %s29_s14, 2  ;;  %p45_p1 = scmp.ne.s32.totalorder %s719_s8, %s715_s7 }
   0x9   : > { %p46_p2 = scmp.eq.s32.totalorder %s731_s11, 0  ;;  %p51_p3 = scmp.ne.s32.totalorder %s715_s7, %s711_s6 }
   0xa   : > { %s1004_s14 = smov (%p31_p0, %s29_s14), 0  ;;  %p52_p5 = scmp.eq.s32.totalorder %s532_s12, 0 }
   0xb   : > { %p794_p4 = por %p46_p2, %p45_p1  ;;  %s33_s17 = ssub.s32 %s727_s10, %s1004_s14 }
   0xc   : > { %p77_p6 = scmp.eq.s32.totalorder %s532_s12, 1  ;;  %p36_p7 = scmp.eq.s32.totalorder %s33_s17, 0 }
   0xd   : > { %p800_p8 = por %p52_p5, %p51_p3  ;;  %p83_p10 = scmp.eq.s32.totalorder %s533_s13, 1 }
   0xe   : > { %p804_p9 = por %p77_p6, %p45_p1  ;;  %p561_p13 = scmp.lt.s32.totalorder %s731_s11, 2 }
   0xf   : > { %s809_s20 = scalar_select %p36_p7, %s719_s8, %s38_s15  }
  0x10   : > { %s991_s19 = scalar_select %p804_p9, 1, 0 }
  0x11   : > { %p811_p11 = por %p83_p10, %p51_p3  ;;  %s103_s22 = sand.u32 1, %s719_s8  }
  0x12   : > { %s536_s23 = sshll.u32 %s103_s22, 6  ;;  %s547_s24 = sshll.u32 %s727_s10, 10 }
  0x13   : > { %s992_s21 = scalar_select %p811_p11, 1, 0 }
  0x14   : > { %s822_s27 = scalar_lea.hbm %s986_s0, %s547_s24  ;;  %s107_s28 = scalar_lea.vmem [#allocation4], %s536_s23 }
  0x15   : > { %s117_s29 = sshll.u32 %s107_s28, 4  ;;  %p828_p0 = pnand %p561_p13, %p794_p4  ;;  %s824_s29 = int_to_ptr.vmem [resolvable:$true] %s117_s29 }
  0x16   : > { %s833_s2 = scalar_lea.sflag [#allocation5], %s103_s22  ;;  %s619_s3 = scalar_lea.hbm %s822_s27, 1024 }
  0x17   : > { %p620_p2 = scmp.ne.s32.totalorder %s822_s27, %s619_s3  ;;  %p621_p3 = pneg %p828_p0 }
  0x18   : > { %s624_s12 = scalar_lea.hbm %s986_s0, 2048  ;;  %p625_p4 = scmp.lt.u32.totalorder %s822_s27, %s986_s0 }
  0x19   : > { %p622_p5 = pnand %p621_p3, %p620_p2  ;;  %p626_p7 = scmp.lt.u32.totalorder %s624_s12, %s619_s3 }
  0x1a   : > { %p628_p13 = scmp.lt.u32.totalorder %s619_s3, %s822_s27 }
  0x1b   : > { %p623_p6 = pneg %p622_p5  ;;  %p627_p10 = por %p626_p7, %p625_p4 }
  0x1d   : > { %p629_p12 = por %p628_p13, %p627_p10 }
  0x1f   : > { %p630_p1 = pnand %p629_p12, %p623_p6 }
  0x21   : > { %633 = shalt.err (!%p630_p1)
}
  0x22   : > { %s634_s16 = scalar_lea.vmem %s824_s29, 1024  ;;  %s733_s17 = smov [#allocation4]  }
  0x23   : > { %p635_p2 = scmp.ne.s32.totalorder %s824_s29, %s634_s16  ;;  %s639_s22 = sshll.u32 %s733_s17, 4  ;;  %s640_s22 = int_to_ptr.vmem [resolvable:$false] %s639_s22 }
  0x24   : > { %s641_s23 = scalar_lea.vmem %s640_s22, 2048  ;;  %p642_p9 = scmp.lt.s32.totalorder %s824_s29, %s640_s22 }
  0x25   : > { %p637_p5 = pnand %p635_p2, %p621_p3  ;;  %p643_p4 = scmp.lt.s32.totalorder %s641_s23, %s634_s16 }
  0x27   : > { %p638_p11 = pneg %p637_p5  ;;  %p644_p7 = por %p643_p4, %p642_p9 }
  0x29   : > { %p645_p10 = pnand %p644_p7, %p638_p11 }
  0x2b   : > { %648 = shalt.err (!%p645_p10)
}
  0x2c   : > { %s734_s24 = smov 128   ;;  %s735_s25 = smov 8  }
  0x2d   : > { %556 = dma.hbm_to_vmem [thread:$0]  (!%p828_p0), %s822_s27, 1024, %s824_s29, %s833_s2, %s734_s24, %s734_s24, %s735_s25  }
  0x2e   : > { %p125_p12 = scmp.lt.s32.totalorder %s731_s11, 3  ;;  %p994_p1 = scmp.ge.s32.totalorder %s731_s11, 1 }
  0x30   : > { %p126_p3 = pnand %p994_p1, %p125_p12 }
  0x31   : > { %s865_s26 = sand.u32 (!%p126_p3), 1, %s715_s7  }
  0x32   : > { %129 = sbr.rel (%p126_p3) target bundleno = 366 (0x16e), region = 24  ;;  %s540_s28 = sshll.u32 (!%p126_p3), %s865_s26, 6 }
  0x33   : > { %s132_s3 = scalar_lea.sflag (!%p126_p3), [#allocation5], %s865_s26  ;;  %s871_s4 = scalar_lea.vmem (!%p126_p3), [#allocation4], %s540_s28 }
  0x39   : > { %702 = dma.done.wait (%p800_p8), %s132_s3, 1024  }
  0x3a   : > { %704 = vsyncadd (%p800_p8), %s132_s3, 4294966272  ;;  %vm156_vm0 = vcmask 139264   ;;  %vm165_vm1 = vcmask 7168   ;;  %vm179_vm2 = vcmask 146568   ;;  %v736_v0 = vmov 0.0   ;;  %v195_v1 = vld [vmem:[%s871_s4 + $0x10] sm:$0xff] }
  0x3b   : > { %158 = vst.msk [vmem:[#allocation2 + $0x18] sm:$0x1] %vm156_vm0, %v736_v0  ;;  %157 = vst.msk [vmem:[#allocation2] sm:$0x1] %vm156_vm0, %v736_v0  ;;  %vm168_vm3 = vcmask 1024   ;;  %vm182_vm4 = vcmask 140424  }
  0x3c   : > { %171 = vst.msk [vmem:[#allocation2 + $0x20] sm:$0xff] %vm165_vm1, %v736_v0  ;;  %167 = vst.msk [vmem:[#allocation2 + $0x8] sm:$0xff] %vm165_vm1, %v736_v0  ;;  %v193_v2 = vld [vmem:[%s871_s4] sm:$0xff]  ;;  %s737_s18 = smov 1   ;;  %v196_v3 = vld [vmem:[%s871_s4 + $0x18] sm:$0xff]  ;;  %vm233_vm5 = vcmask 138248  }
  0x3d   : > { %159 = vst.msk [vmem:[#allocation2 + $0x30] sm:$0x1] %vm156_vm0, %v736_v0  ;;  %160 = vst.msk [vmem:[#allocation2 + $0x48] sm:$0x1] %vm156_vm0, %v736_v0  ;;  %213 = vrot.lane.b32.xlu1 %v195_v1, %s737_s18  ;;  %209 = vrot.lane.b32.xlu0 %v193_v2, %s737_s18  ;;  %v194_v4 = vld [vmem:[%s871_s4 + $0x8] sm:$0xff]  ;;  %v197_v6 = vld [vmem:[%s871_s4 + $0x20] sm:$0xff] }
  0x3e   : > { %161 = vst.msk [vmem:[#allocation2 + $0x11] sm:$0x1] %vm156_vm0, %v736_v0  ;;  %162 = vst.msk [vmem:[#allocation2 + $0x29] sm:$0x1] %vm156_vm0, %v736_v0  ;;  %v198_v5 = vld [vmem:[%s871_s4 + $0x28] sm:$0xff]  ;;  %v200_v7 = vld [vmem:[%s871_s4 + $0x38] sm:$0xff] }
  0x3f   : > { %163 = vst.msk [vmem:[#allocation2 + $0x41] sm:$0x1] %vm156_vm0, %v736_v0  ;;  %164 = vst.msk [vmem:[#allocation2 + $0x59] sm:$0x1] %vm156_vm0, %v736_v0  ;;  %v199_v8 = vld [vmem:[%s871_s4 + $0x30] sm:$0xff]  ;;  %vm306_vm6 = vcmask 146432  }
  0x40   : > { %174 = vst.msk [vmem:[#allocation2 + $0x38] sm:$0xff] %vm165_vm1, %v736_v0  ;;  %177 = vst.msk [vmem:[#allocation2 + $0x50] sm:$0xff] %vm165_vm1, %v736_v0  ;;  %s738_s27 = smov 127   ;;  %s739_s29 = smov 126   ;;  %vm419_vm7 = vcmask 130048  }
  0x41   : > { %170 = vst.msk [vmem:[#allocation2 + $0x18] sm:$0xff] %vm165_vm1, %v736_v0  ;;  %166 = vst.msk [vmem:[#allocation2] sm:$0xff] %vm165_vm1, %v736_v0  ;;  %215 = vrot.lane.b32.xlu1 %v196_v3, %s737_s18  ;;  %211 = vrot.lane.b32.xlu0 %v194_v4, %s737_s18  ;;  %s153_s30 = scalar_lea.vmem [#allocation7], %s540_s28  ;;  %s548_s2 = sshll.u32 %s723_s9, 10 }
  0x42   : > { %185 = vst.msk [vmem:[#allocation2 + $0x20] sm:$0xff] %vm179_vm2, %v736_v0  ;;  %181 = vst.msk [vmem:[#allocation2 + $0x8] sm:$0xff] %vm179_vm2, %v736_v0  ;;  %s445_s5 = sshll.u32 %s153_s30, 4  ;;  %s933_s15 = scalar_lea.hbm %s987_s1, %s548_s2  ;;  %s935_s5 = int_to_ptr.vmem [resolvable:$true] %s445_s5 }
  0x43   : > { %173 = vst.msk [vmem:[#allocation2 + $0x30] sm:$0xff] %vm165_vm1, %v736_v0  ;;  %176 = vst.msk [vmem:[#allocation2 + $0x48] sm:$0xff] %vm165_vm1, %v736_v0  ;;  %s429_s9 = scalar_lea.sflag [#allocation6], %s865_s26  ;;  %s649_s16 = scalar_lea.vmem %s935_s5, 1024 }
  0x44   : > { %188 = vst.msk [vmem:[#allocation2 + $0x38] sm:$0xff] %vm179_vm2, %v736_v0  ;;  %191 = vst.msk [vmem:[#allocation2 + $0x50] sm:$0xff] %vm179_vm2, %v736_v0  ;;  %p650_p8 = scmp.ne.s32.totalorder %s935_s5, %s649_s16  ;;  %p995_p9 = scmp.ne.s32.totalorder %s991_s19, 0 }
  0x45   : > { %172 = vst.msk [vmem:[#allocation2 + $0x28] sm:$0x3] %vm168_vm3, %v736_v0  ;;  %169 = vst.msk [vmem:[#allocation2 + $0x10] sm:$0x3] %vm168_vm3, %v736_v0  ;;  %219 = vrot.lane.b32.xlu1 %v198_v5, %s737_s18  ;;  %217 = vrot.lane.b32.xlu0 %v197_v6, %s737_s18  ;;  %s740_s17 = smov [#allocation7]  }
  0x46   : > { %175 = vst.msk [vmem:[#allocation2 + $0x40] sm:$0x3] %vm168_vm3, %v736_v0  ;;  %178 = vst.msk [vmem:[#allocation2 + $0x58] sm:$0x3] %vm168_vm3, %v736_v0  ;;  %p651_p11 = pnand %p650_p8, %p995_p9  ;;  %s653_s22 = sshll.u32 %s740_s17, 4  ;;  %s654_s22 = int_to_ptr.vmem [resolvable:$false] %s653_s22 }
  0x47   : > { %184 = vst.msk [vmem:[#allocation2 + $0x18] sm:$0xff] %vm179_vm2, %v736_v0  ;;  %180 = vst.msk [vmem:[#allocation2] sm:$0xff] %vm179_vm2, %v736_v0  ;;  %s655_s23 = scalar_lea.vmem %s654_s22, 2048  ;;  %p656_p6 = scmp.lt.s32.totalorder %s935_s5, %s654_s22 }
  0x48   : > { %186 = vst.msk [vmem:[#allocation2 + $0x28] sm:$0x3] %vm182_vm4, %v736_v0  ;;  %183 = vst.msk [vmem:[#allocation2 + $0x10] sm:$0x3] %vm182_vm4, %v736_v0  ;;  %p652_p0 = pneg %p651_p11  ;;  %p657_p13 = scmp.lt.s32.totalorder %s655_s23, %s649_s16 }
  0x49   : > { %187 = vst.msk [vmem:[#allocation2 + $0x30] sm:$0xff] %vm179_vm2, %v736_v0  ;;  %190 = vst.msk [vmem:[#allocation2 + $0x48] sm:$0xff] %vm179_vm2, %v736_v0  ;;  %223 = vrot.lane.b32.xlu1 %v200_v7, %s737_s18  ;;  %221 = vrot.lane.b32.xlu0 %v199_v8, %s737_s18 }
  0x4a   : > { %189 = vst.msk [vmem:[#allocation2 + $0x40] sm:$0x3] %vm182_vm4, %v736_v0  ;;  %192 = vst.msk [vmem:[#allocation2 + $0x58] sm:$0x3] %vm182_vm4, %v736_v0  ;;  %p658_p2 = por %p657_p13, %p656_p6 }
  0x4c   : > { %p659_p5 = pnand %p658_p2, %p652_p0 }
  0xaf   : > { %v214_v9 = vpop.permute.xlu1 %213  ;;  %v210_v10 = vpop.permute.xlu0 %209 }
  0xb0   : > { %236 = vst.msk [vmem:[#allocation2 + $0x19] sm:$0xff] %vm233_vm5, %v214_v9  ;;  %234 = vst.msk [vmem:[#allocation2 + $0x1] sm:$0xff] %vm233_vm5, %v210_v10 }
  0xb3   : > { %v216_v11 = vpop.permute.xlu1 %215  ;;  %v212_v12 = vpop.permute.xlu0 %211 }
  0xb4   : > { %237 = vst.msk [vmem:[#allocation2 + $0x21] sm:$0xff] %vm233_vm5, %v216_v11  ;;  %235 = vst.msk [vmem:[#allocation2 + $0x9] sm:$0xff] %vm233_vm5, %v212_v12 }
  0xb7   : > { %v244_v13 = vld [vmem:[#allocation2 + $0x18] sm:$0xff]  ;;  %v242_v15 = vld [vmem:[#allocation2] sm:$0xff]  ;;  %v220_v16 = vpop.permute.xlu1 %219  ;;  %v218_v17 = vpop.permute.xlu0 %217 }
  0xb8   : > { %v260_v14 = vld [vmem:[#allocation2 + $0x19] sm:$0xff]  ;;  %v252_v18 = vmul.f32 0.25, %v244_v13  ;;  %v258_v20 = vld [vmem:[#allocation2 + $0x1] sm:$0xff]  ;;  %239 = vst.msk [vmem:[#allocation2 + $0x39] sm:$0xff] %vm233_vm5, %v220_v16  ;;  %238 = vst.msk [vmem:[#allocation2 + $0x31] sm:$0xff] %vm233_vm5, %v218_v17  ;;  %v250_v22 = vmul.f32 0.25, %v242_v15 }
  0xb9   : > { %v268_v19 = vmul.f32 0.5, %v260_v14  ;;  %v266_v23 = vmul.f32 0.5, %v258_v20 }
  0xbb   : > { %v276_v21 = vadd.f32 %v268_v19, %v252_v18  ;;  %v245_v24 = vld [vmem:[#allocation2 + $0x20] sm:$0xff]  ;;  %v224_v27 = vpop.permute.xlu1 %223  ;;  %v222_v28 = vpop.permute.xlu0 %221  ;;  %v243_v33 = vld [vmem:[#allocation2 + $0x8] sm:$0xff]  ;;  %v274_v40 = vadd.f32 %v266_v23, %v250_v22 }
  0xbc   : > { %v261_v25 = vld [vmem:[#allocation2 + $0x21] sm:$0xff]  ;;  %v253_v29 = vmul.f32 0.25, %v245_v24  ;;  %v259_v34 = vld [vmem:[#allocation2 + $0x9] sm:$0xff]  ;;  %241 = vst.msk [vmem:[#allocation2 + $0x51] sm:$0xff] %vm233_vm5, %v224_v27  ;;  %240 = vst.msk [vmem:[#allocation2 + $0x49] sm:$0xff] %vm233_vm5, %v222_v28  ;;  %v251_v36 = vmul.f32 0.25, %v243_v33 }
  0xbd   : > { %v284_v26 = vld [vmem:[#allocation2 + $0x1a] sm:$0xff]  ;;  %v269_v30 = vmul.f32 0.5, %v261_v25  ;;  %v285_v31 = vld [vmem:[#allocation2 + $0x22] sm:$0xff]  ;;  %v267_v37 = vmul.f32 0.5, %v259_v34  ;;  %v283_v39 = vld [vmem:[#allocation2 + $0xa] sm:$0xff] }
  0xbe   : > { %v292_v32 = vmul.f32 0.25, %v284_v26  ;;  %v293_v35 = vmul.f32 0.25, %v285_v31  ;;  %v282_v38 = vld [vmem:[#allocation2 + $0x2] sm:$0xff]  ;;  %v291_v45 = vmul.f32 0.25, %v283_v39 }
  0xbf   : > { %v277_v41 = vadd.f32 %v269_v30, %v253_v29  ;;  %v290_v43 = vmul.f32 0.25, %v282_v38  ;;  %v275_v44 = vadd.f32 %v267_v37, %v251_v36  ;;  %v263_v46 = vld [vmem:[#allocation2 + $0x39] sm:$0xff]  ;;  %v246_v48 = vld [vmem:[#allocation2 + $0x30] sm:$0xff] }
  0xc0   : > { %v300_v42 = vadd.f32 %v292_v32, %v276_v21  ;;  %v287_v47 = vld [vmem:[#allocation2 + $0x3a] sm:$0xff]  ;;  %v271_v51 = vmul.f32 0.5, %v263_v46  ;;  %v262_v53 = vld [vmem:[#allocation2 + $0x31] sm:$0xff]  ;;  %v254_v56 = vmul.f32 0.25, %v246_v48 }
  0xc1   : > { %v301_v49 = vadd.f32 %v293_v35, %v277_v41  ;;  %v298_v50 = vadd.f32 %v290_v43, %v274_v40  ;;  %v247_v52 = vld [vmem:[#allocation2 + $0x38] sm:$0xff]  ;;  %v299_v55 = vadd.f32 %v291_v45, %v275_v44  ;;  %v270_v58 = vmul.f32 0.5, %v262_v53 }
  0xc2   : > { %v286_v54 = vld [vmem:[#allocation2 + $0x32] sm:$0xff]  ;;  %309 = vst.msk [vmem:[#allocation3 + $0x10] sm:$0xff] %vm306_vm6, %v300_v42  ;;  %v255_v57 = vmul.f32 0.25, %v247_v52  ;;  %v295_v59 = vmul.f32 0.25, %v287_v47 }
  0xc3   : > { %v294_v60 = vmul.f32 0.25, %v286_v54  ;;  %307 = vst.msk [vmem:[#allocation3] sm:$0xff] %vm306_vm6, %v298_v50  ;;  %310 = vst.msk [vmem:[#allocation3 + $0x18] sm:$0xff] %vm306_vm6, %v301_v49  ;;  %v278_v61 = vadd.f32 %v270_v58, %v254_v56  ;;  %v265_v63 = vld [vmem:[#allocation2 + $0x51] sm:$0xff]  ;;  %v248_v1 = vld [vmem:[#allocation2 + $0x48] sm:$0xff] }
  0xc4   : > { %v279_v62 = vadd.f32 %v271_v51, %v255_v57  ;;  %v289_v0 = vld [vmem:[#allocation2 + $0x52] sm:$0xff]  ;;  %308 = vst.msk [vmem:[#allocation3 + $0x8] sm:$0xff] %vm306_vm6, %v299_v55  ;;  %v273_v2 = vmul.f32 0.5, %v265_v63  ;;  %v256_v5 = vmul.f32 0.25, %v248_v1  ;;  %v264_v6 = vld [vmem:[#allocation2 + $0x49] sm:$0xff] }
  0xc5   : > { %v297_v3 = vmul.f32 0.25, %v289_v0  ;;  %v249_v4 = vld [vmem:[#allocation2 + $0x50] sm:$0xff]  ;;  %v302_v8 = vadd.f32 %v294_v60, %v278_v61  ;;  %v272_v10 = vmul.f32 0.5, %v264_v6 }
  0xc6   : > { %v288_v7 = vld [vmem:[#allocation2 + $0x4a] sm:$0xff]  ;;  %v257_v9 = vmul.f32 0.25, %v249_v4  ;;  %v303_v12 = vadd.f32 %v295_v59, %v279_v62 }
  0xc7   : > { %v296_v11 = vmul.f32 0.25, %v288_v7  ;;  %v280_v13 = vadd.f32 %v272_v10, %v256_v5  ;;  %311 = vst.msk [vmem:[#allocation3 + $0x20] sm:$0xff] %vm306_vm6, %v302_v8 }
  0xc8   : > { %v281_v14 = vadd.f32 %v273_v2, %v257_v9  ;;  %312 = vst.msk [vmem:[#allocation3 + $0x28] sm:$0xff] %vm306_vm6, %v303_v12 }
  0xc9   : > { %v304_v15 = vadd.f32 %v296_v11, %v280_v13  ;;  %v317_v21 = vld [vmem:[#allocation3 + $0x10] sm:$0xff] }
  0xca   : > { %v315_v16 = vld [vmem:[#allocation3] sm:$0xff]  ;;  %v305_v17 = vadd.f32 %v297_v3, %v281_v14  ;;  %v318_v22 = vld [vmem:[#allocation3 + $0x18] sm:$0xff]  ;;  %v333_v23 = vmul.f32 0.5, %v317_v21  ;;  %v325_v35 = vmul.f32 0.25, %v317_v21 }
  0xcb   : > { %v331_v18 = vmul.f32 0.5, %v315_v16  ;;  %v316_v19 = vld [vmem:[#allocation3 + $0x8] sm:$0xff]  ;;  %313 = vst.msk [vmem:[#allocation3 + $0x30] sm:$0xff] %vm306_vm6, %v304_v15  ;;  %v334_v25 = vmul.f32 0.5, %v318_v22  ;;  %v323_v33 = vmul.f32 0.25, %v315_v16  ;;  %v326_v36 = vmul.f32 0.25, %v318_v22 }
  0xcc   : > { %v332_v20 = vmul.f32 0.5, %v316_v19  ;;  %314 = vst.msk [vmem:[#allocation3 + $0x38] sm:$0xff] %vm306_vm6, %v305_v17  ;;  %v324_v34 = vmul.f32 0.25, %v316_v19 }
  0xcd   : > { %347 = vrot.lane.b32.xlu0 %v331_v18, %s738_s27 }
  0xce   : > { %349 = vrot.lane.b32.xlu1 %v332_v20, %s738_s27  ;;  %v319_v24 = vld [vmem:[#allocation3 + $0x20] sm:$0xff] }
  0xcf   : > { %v335_v26 = vmul.f32 0.5, %v319_v24  ;;  %v320_v27 = vld [vmem:[#allocation3 + $0x28] sm:$0xff]  ;;  %v327_v37 = vmul.f32 0.25, %v319_v24 }
  0xd0   : > { %v336_v29 = vmul.f32 0.5, %v320_v27  ;;  %v328_v38 = vmul.f32 0.25, %v320_v27 }
  0xd1   : > { %351 = vrot.lane.b32.xlu0 %v333_v23, %s738_s27 }
  0xd2   : > { %353 = vrot.lane.b32.xlu1 %v334_v25, %s738_s27  ;;  %v321_v28 = vld [vmem:[#allocation3 + $0x30] sm:$0xff] }
  0xd3   : > { %v337_v30 = vmul.f32 0.5, %v321_v28  ;;  %v322_v31 = vld [vmem:[#allocation3 + $0x38] sm:$0xff]  ;;  %v329_v39 = vmul.f32 0.25, %v321_v28 }
  0xd4   : > { %v338_v32 = vmul.f32 0.5, %v322_v31  ;;  %v330_v40 = vmul.f32 0.25, %v322_v31 }
  0xd5   : > { %355 = vrot.lane.b32.xlu0 %v335_v26, %s738_s27 }
  0xd6   : > { %357 = vrot.lane.b32.xlu1 %v336_v29, %s738_s27 }
  0xd9   : > { %359 = vrot.lane.b32.xlu0 %v337_v30, %s738_s27 }
  0xda   : > { %361 = vrot.lane.b32.xlu1 %v338_v32, %s738_s27 }
  0xdd   : > { %387 = vrot.lane.b32.xlu0 %v323_v33, %s739_s29 }
  0xde   : > { %389 = vrot.lane.b32.xlu1 %v324_v34, %s739_s29 }
  0xe1   : > { %391 = vrot.lane.b32.xlu0 %v325_v35, %s739_s29 }
  0xe2   : > { %393 = vrot.lane.b32.xlu1 %v326_v36, %s739_s29 }
  0xe5   : > { %395 = vrot.lane.b32.xlu0 %v327_v37, %s739_s29 }
  0xe6   : > { %397 = vrot.lane.b32.xlu1 %v328_v38, %s739_s29 }
  0xe9   : > { %399 = vrot.lane.b32.xlu0 %v329_v39, %s739_s29 }
  0xea   : > { %401 = vrot.lane.b32.xlu1 %v330_v40, %s739_s29 }
 0x13f   : > { %v348_v41 = vpop.permute.xlu0 %347 }
 0x140   : > { %v350_v42 = vpop.permute.xlu1 %349  ;;  %v371_v49 = vadd.f32 %v348_v41, %v323_v33 }
 0x141   : > { %v372_v50 = vadd.f32 %v350_v42, %v324_v34 }
 0x143   : > { %v352_v43 = vpop.permute.xlu0 %351 }
 0x144   : > { %v354_v44 = vpop.permute.xlu1 %353  ;;  %v373_v55 = vadd.f32 %v352_v43, %v325_v35 }
 0x145   : > { %v374_v56 = vadd.f32 %v354_v44, %v326_v36 }
 0x147   : > { %v356_v45 = vpop.permute.xlu0 %355 }
 0x148   : > { %v358_v46 = vpop.permute.xlu1 %357  ;;  %v375_v61 = vadd.f32 %v356_v45, %v327_v37 }
 0x149   : > { %v376_v62 = vadd.f32 %v358_v46, %v328_v38 }
 0x14b   : > { %v360_v47 = vpop.permute.xlu0 %359 }
 0x14c   : > { %v362_v48 = vpop.permute.xlu1 %361  ;;  %v377_v3 = vadd.f32 %v360_v47, %v329_v39 }
 0x14d   : > { %v378_v4 = vadd.f32 %v362_v48, %v330_v40 }
 0x14f   : > { %v388_v51 = vpop.permute.xlu0 %387 }
 0x150   : > { %v411_v52 = vadd.f32 %v388_v51, %v371_v49  ;;  %v390_v53 = vpop.permute.xlu1 %389 }
 0x151   : > { %v412_v54 = vadd.f32 %v390_v53, %v372_v50 }
 0x152   : > { %420 = vst.msk [vmem:[%s153_s30] sm:$0xff] %vm419_vm7, %v411_v52 }
 0x153   : > { %421 = vst.msk [vmem:[%s153_s30 + $0x8] sm:$0xff] %vm419_vm7, %v412_v54  ;;  %v392_v57 = vpop.permute.xlu0 %391 }
 0x154   : > { %v413_v58 = vadd.f32 %v392_v57, %v373_v55  ;;  %v394_v59 = vpop.permute.xlu1 %393 }
 0x155   : > { %v414_v60 = vadd.f32 %v394_v59, %v374_v56 }
 0x156   : > { %422 = vst.msk [vmem:[%s153_s30 + $0x10] sm:$0xff] %vm419_vm7, %v413_v58 }
 0x157   : > { %423 = vst.msk [vmem:[%s153_s30 + $0x18] sm:$0xff] %vm419_vm7, %v414_v60  ;;  %v396_v63 = vpop.permute.xlu0 %395 }
 0x158   : > { %v415_v0 = vadd.f32 %v396_v63, %v375_v61  ;;  %v398_v1 = vpop.permute.xlu1 %397 }
 0x159   : > { %v416_v2 = vadd.f32 %v398_v1, %v376_v62 }
 0x15a   : > { %424 = vst.msk [vmem:[%s153_s30 + $0x20] sm:$0xff] %vm419_vm7, %v415_v0 }
 0x15b   : > { %425 = vst.msk [vmem:[%s153_s30 + $0x28] sm:$0xff] %vm419_vm7, %v416_v2  ;;  %v400_v5 = vpop.permute.xlu0 %399 }
 0x15c   : > { %v417_v6 = vadd.f32 %v400_v5, %v377_v3  ;;  %v402_v7 = vpop.permute.xlu1 %401 }
 0x15d   : > { %v418_v8 = vadd.f32 %v402_v7, %v378_v4 }
 0x15e   : > { %426 = vst.msk [vmem:[%s153_s30 + $0x30] sm:$0xff] %vm419_vm7, %v417_v6 }
 0x15f   : > { %427 = vst.msk [vmem:[%s153_s30 + $0x38] sm:$0xff] %vm419_vm7, %v418_v8 }
 0x160   : > { %662 = shalt.err (!%p659_p5)
}
 0x161   : > { %s663_s24 = scalar_lea.hbm %s933_s15, 1024  ;;  %s667_s3 = scalar_lea.hbm %s987_s1, 2048 }
 0x162   : > { %p664_p4 = scmp.ne.s32.totalorder %s933_s15, %s663_s24  ;;  %p668_p12 = scmp.lt.u32.totalorder %s933_s15, %s987_s1 }
 0x163   : > { %p669_p1 = scmp.lt.u32.totalorder %s667_s3, %s663_s24  ;;  %p671_p8 = scmp.lt.u32.totalorder %s663_s24, %s933_s15 }
 0x164   : > { %p665_p7 = pnand %p664_p4, %p995_p9 }
 0x165   : > { %p670_p3 = por %p669_p1, %p668_p12 }
 0x166   : > { %p666_p10 = pneg %p665_p7 }
 0x167   : > { %p672_p11 = por %p671_p8, %p670_p3 }
 0x169   : > { %p673_p0 = pnand %p672_p11, %p666_p10 }
 0x16b   : > { %676 = shalt.err (!%p673_p0)
}
 0x16c   : > { %s741_s27 = smov 128   ;;  %s742_s29 = smov 8  }
 0x16d   : > { %551 = dma.vmem_to_hbm [thread:$0]  (%p995_p9), %s935_s5, 1024, %s933_s15, %s429_s9, %s741_s27, %s741_s27, %s742_s29  }
 0x16e PF: > { %s460_s30 = sand.u32 1, %s711_s6   ;;  %p996_p6 = scmp.ne.s32.totalorder %s992_s21, 0 }
 0x16f   : > { %p997_p13 = scmp.ge.s32.totalorder %s731_s11, 2  ;;  %s461_s2 = scalar_lea.sflag [#allocation6], %s460_s30 }
 0x171   : > { %p558_p2 = pnand %p997_p13, %p996_p6 }
 0x173   : > { %706 = dma.done.wait (!%p558_p2), %s461_s2, 1024  }
 0x174   : > { %708 = vsyncadd (!%p558_p2), %s461_s2, 4294966272  ;;  %s17_s11 = sadd.s32 1, %s731_s11   ;;  %s998_s6 = smov %s715_s7 }
 0x175   : > { %p14_p5 = scmp.ge.s32.totalorder %s17_s11, 4   ;;  %s999_s7 = smov %s719_s8 }
 0x176   : > { %s1000_s8 = smov %s809_s20  ;;  %s1001_s9 = smov %s727_s10 }
 0x177   : > { %s1002_s10 = smov %s1004_s14  ;;  %16 = sbr.rel (!%p14_p5) target bundleno = 6 (0x6), region = 69 }
 0x17e   :  { %466 = vsyncpa [#allocation5], 1 }
 0x17f   :  { %468 = vsyncpa [#allocation5 + $0x1], 1 }
 0x180   :  { %469 = vsyncpa [#allocation6], 1 }
 0x181   :  { %471 = vsyncpa [#allocation6 + $0x1], 1 }

</bundles_post_ra>
